<compile_context>
chip_gen: v7x
topology: tpu7x:2x2x1
jax: 0.10.0
libtpu: 0.0.40
codegen_flags: <defaults>
</compile_context>

<pallas_src>
import functools

import jax
import jax.numpy as jnp
from jax.experimental import pallas as pl
from jax.experimental.pallas import tpu as pltpu

_EPS = 1e-12                      # torch.nn.functional.normalize default eps
_DMA_BLOCK_TARGET = 4 * 1024 * 1024   # ~4 MiB per input block -> near HBM roofline


def _regression_loss_kernel(x_ref, y_ref, o_ref, *, k, d):
    # x_ref, y_ref: (tb, k*d) tiles (k original rows packed per lane-row).
    # o_ref:        (tb, k) losses, one per original row.
    x = x_ref[...].astype(jnp.float32)
    y = y_ref[...].astype(jnp.float32)

    xx = x * x
    yy = y * y
    xy = x * y

    def seg_sum(p):
        if k == 1:
            return jnp.sum(p, axis=-1, keepdims=True)                    # (tb, 1)
        cols = [jnp.sum(p[:, j * d:(j + 1) * d], axis=-1, keepdims=True)
                for j in range(k)]
        return jnp.concatenate(cols, axis=-1)                            # (tb, k)

    sx, sy, sxy = seg_sum(xx), seg_sum(yy), seg_sum(xy)

    eps = jnp.float32(_EPS)
    nx = jnp.maximum(jnp.sqrt(sx), eps)    # identical clamping to F.normalize
    ny = jnp.maximum(jnp.sqrt(sy), eps)
    o_ref[...] = (2.0 - 2.0 * sxy / (nx * ny)).astype(o_ref.dtype)


def _round_down(v, m):
    return (v // m) * m


def _vmem_capacity_bytes():
    try:
        info = pltpu.get_tpu_info()
        cap = getattr(info, "vmem_capacity_bytes", None)
        if cap:
            return int(cap)
    except Exception:
        pass
    return 64 * 1024 * 1024   # conservative default == v7x physical VMEM


def _pick_pack_factor(B, D):
    """How many original rows to pack per lane-row (fills up to 128 lanes)."""
    if D >= 128:
        return 1
    k = max(128 // D, 1)
    while k > 1 and B % k != 0:
        k -= 1
    return k


def _pick_row_tile(bp, d_eff, itemsize, vmem_limit, row_align):
    """Row tile (in packed rows) targeting ~4 MiB input blocks within the VMEM budget."""
    d_vmem = pl.cdiv(d_eff, 128) * 128            # lane padding inside VMEM
    # Live VMEM bytes per packed row:
    #   x & y blocks, double-buffered, in HBM dtype        -> 4 * itemsize
    #   f32 upcasts of x & y plus ~3 transient products    -> 5 * 4
    per_row = d_vmem * (4 * itemsize + 5 * 4)
    budget = int(vmem_limit * 0.8)                # headroom for semaphores / misc
    tb_cap = max(budget // per_row, row_align)
    tb_dma = max(_DMA_BLOCK_TARGET // (d_vmem * itemsize), row_align)
    tb = max(_round_down(min(tb_cap, tb_dma), row_align), row_align)
    if tb >= bp:
        if bp >= 2 * row_align:
            # Split so a v7x megacore (2 TCs) gets >= 2 parallel grid steps.
            tb = max(_round_down(pl.cdiv(bp, 2), row_align), row_align)
        else:
            tb = bp                                # tiny batch: single full-extent block
    return tb


def regression_loss(x, y, *, row_tile=None, pack_rows=True):
    """Pallas implementation of RegressionLoss.forward for 2-D (B, D) inputs."""
    # TODO(synk): inputs with ndim > 2 (where normalize dim=1 != sum dim=-1) are not handled.
    assert x.shape == y.shape and x.ndim == 2
    B, D = x.shape
    out_dtype = x.dtype
    if B == 0:
        return jnp.zeros((0,), out_dtype)

    k = _pick_pack_factor(B, D) if pack_rows else 1
    bp, d_eff = B // k, k * D
    if k > 1:
        # Row-major (B, D) -> (B//k, k*D): k small-D rows share one 128-lane row, so VMEM
        # lanes / vld slots are fully used and the row tile can be proportionally larger.
        # If the producer's HBM layout makes this a real copy, call with pack_rows=False.
        x = x.reshape(bp, d_eff)
        y = y.reshape(bp, d_eff)

    itemsize = jnp.dtype(x.dtype).itemsize
    row_align = max(8, 32 // itemsize)            # sublane alignment (f32:8, bf16:16, i8:32)
    vmem_cap = _vmem_capacity_bytes()
    vmem_limit = int(min((vmem_cap * 3) // 4, 96 * 1024 * 1024))  # ~96 MiB v5e/v6e, ~48 MiB v7x

    if row_tile is None:
        tb = _pick_row_tile(bp, d_eff, itemsize, vmem_limit, row_align)
    else:
        tb = min(int(row_tile), bp)
        if tb < bp:
            tb = max(_round_down(tb, row_align), row_align)

    # TODO(synk): add a second ("arbitrary") grid axis over D with VMEM scratch accumulators
    # (sx/sy/sxy) if a single row block of width d_eff no longer fits VMEM.

    grid = (pl.cdiv(bp, tb),)   # ragged last block: OOB rows are don't-care, OOB stores masked

    kernel = functools.partial(_regression_loss_kernel, k=k, d=D)
    out = pl.pallas_call(
        kernel,
        out_shape=jax.ShapeDtypeStruct((bp, k), out_dtype),
        grid=grid,
        in_specs=[
            pl.BlockSpec((tb, d_eff), lambda i: (i, 0)),
            pl.BlockSpec((tb, d_eff), lambda i: (i, 0)),
        ],
        out_specs=pl.BlockSpec((tb, k), lambda i: (i, 0)),
        compiler_params=pltpu.CompilerParams(
            dimension_semantics=("parallel",),
            vmem_limit_bytes=vmem_limit,
        ),
    )(x, y)
    return out.reshape(bp * k)   # bp * k == B


def _reference(x, y):
    eps = 1e-12
    xn = x / jnp.maximum(jnp.linalg.norm(x, axis=1, keepdims=True), eps)
    yn = y / jnp.maximum(jnp.linalg.norm(y, axis=1, keepdims=True), eps)
    return 2.0 - 2.0 * jnp.sum(xn * yn, axis=-1)


if __name__ == "__main__":
    key = jax.random.PRNGKey(0)
    kx, ky = jax.random.split(key)

    def check(B, D, **kw):
        x = jax.random.normal(kx, (B, D), dtype=jnp.float32)
        y = jax.random.normal(ky, (B, D), dtype=jnp.float32)
        out = regression_loss(x, y, **kw)
        jax.block_until_ready(out)
        ref = _reference(x, y)
        assert out.shape == (B,), (out.shape, B)
        assert jnp.allclose(out, ref, atol=1e-5, rtol=1e-5), (B, D, kw)

    check(8, 32)                                    # packed (k=4), single full-extent block
    check(200, 32)                                  # packed, auto tile, >=2 grid steps, ragged
    check(200, 32, pack_rows=False, row_tile=64)    # unpacked D<128, ragged multi-tile path
    check(7, 160)                                   # D>128 (not x128), tiny full-extent block

    print("KERNEL_OK")
</pallas_src>

<mosaic_0001>
module attributes {stable_mosaic.version = 11 : i64} {
  func.func @_regression_loss_kernel(%arg0: i32, %arg1: memref<2x128xf32, #tpu.memory_space<vmem>>, %arg2: memref<2x128xf32, #tpu.memory_space<vmem>>, %arg3: memref<2x4xf32, #tpu.memory_space<vmem>>) attributes {dimension_semantics = [#tpu.dimension_semantics<parallel>], iteration_bounds = array<i64: 1>, scalar_prefetch = 0 : i64, scratch_operands = 0 : i64, tpu.core_type = #tpu.core_type<tc>, window_params = [{transform_indices = @transform_0, window_bounds = array<i64: 2, 128>}, {transform_indices = @transform_1, window_bounds = array<i64: 2, 128>}, {transform_indices = @transform_2, window_bounds = array<i64: 2, 4>}]} {
    %c0 = arith.constant 0 : index
    %c0_0 = arith.constant 0 : index
    %0 = vector.load %arg1[%c0, %c0_0] : memref<2x128xf32, #tpu.memory_space<vmem>>, vector<2x128xf32>
    %c0_1 = arith.constant 0 : index
    %c0_2 = arith.constant 0 : index
    %1 = vector.load %arg2[%c0_1, %c0_2] : memref<2x128xf32, #tpu.memory_space<vmem>>, vector<2x128xf32>
    %2 = arith.mulf %0, %0 : vector<2x128xf32>
    %3 = arith.mulf %1, %1 : vector<2x128xf32>
    %4 = arith.mulf %0, %1 : vector<2x128xf32>
    %5 = vector.extract_strided_slice %2 {offsets = [0, 0], sizes = [2, 32], strides = [1, 1]} : vector<2x128xf32> to vector<2x32xf32>
    %cst = arith.constant dense<0.000000e+00> : vector<2xf32>
    %6 = vector.multi_reduction <add>, %5, %cst [1] : vector<2x32xf32> to vector<2xf32>
    %7 = vector.shape_cast %6 : vector<2xf32> to vector<2x1xf32>
    %8 = vector.extract_strided_slice %2 {offsets = [0, 32], sizes = [2, 32], strides = [1, 1]} : vector<2x128xf32> to vector<2x32xf32>
    %cst_3 = arith.constant dense<0.000000e+00> : vector<2xf32>
    %9 = vector.multi_reduction <add>, %8, %cst_3 [1] : vector<2x32xf32> to vector<2xf32>
    %10 = vector.shape_cast %9 : vector<2xf32> to vector<2x1xf32>
    %11 = vector.extract_strided_slice %2 {offsets = [0, 64], sizes = [2, 32], strides = [1, 1]} : vector<2x128xf32> to vector<2x32xf32>
    %cst_4 = arith.constant dense<0.000000e+00> : vector<2xf32>
    %12 = vector.multi_reduction <add>, %11, %cst_4 [1] : vector<2x32xf32> to vector<2xf32>
    %13 = vector.shape_cast %12 : vector<2xf32> to vector<2x1xf32>
    %14 = vector.extract_strided_slice %2 {offsets = [0, 96], sizes = [2, 32], strides = [1, 1]} : vector<2x128xf32> to vector<2x32xf32>
    %cst_5 = arith.constant dense<0.000000e+00> : vector<2xf32>
    %15 = vector.multi_reduction <add>, %14, %cst_5 [1] : vector<2x32xf32> to vector<2xf32>
    %16 = vector.shape_cast %15 : vector<2xf32> to vector<2x1xf32>
    %17 = tpu.concatenate %7, %10, %13, %16 in 1 : vector<2x1xf32>, vector<2x1xf32>, vector<2x1xf32>, vector<2x1xf32> -> vector<2x4xf32>
    %18 = vector.extract_strided_slice %3 {offsets = [0, 0], sizes = [2, 32], strides = [1, 1]} : vector<2x128xf32> to vector<2x32xf32>
    %cst_6 = arith.constant dense<0.000000e+00> : vector<2xf32>
    %19 = vector.multi_reduction <add>, %18, %cst_6 [1] : vector<2x32xf32> to vector<2xf32>
    %20 = vector.shape_cast %19 : vector<2xf32> to vector<2x1xf32>
    %21 = vector.extract_strided_slice %3 {offsets = [0, 32], sizes = [2, 32], strides = [1, 1]} : vector<2x128xf32> to vector<2x32xf32>
    %cst_7 = arith.constant dense<0.000000e+00> : vector<2xf32>
    %22 = vector.multi_reduction <add>, %21, %cst_7 [1] : vector<2x32xf32> to vector<2xf32>
    %23 = vector.shape_cast %22 : vector<2xf32> to vector<2x1xf32>
    %24 = vector.extract_strided_slice %3 {offsets = [0, 64], sizes = [2, 32], strides = [1, 1]} : vector<2x128xf32> to vector<2x32xf32>
    %cst_8 = arith.constant dense<0.000000e+00> : vector<2xf32>
    %25 = vector.multi_reduction <add>, %24, %cst_8 [1] : vector<2x32xf32> to vector<2xf32>
    %26 = vector.shape_cast %25 : vector<2xf32> to vector<2x1xf32>
    %27 = vector.extract_strided_slice %3 {offsets = [0, 96], sizes = [2, 32], strides = [1, 1]} : vector<2x128xf32> to vector<2x32xf32>
    %cst_9 = arith.constant dense<0.000000e+00> : vector<2xf32>
    %28 = vector.multi_reduction <add>, %27, %cst_9 [1] : vector<2x32xf32> to vector<2xf32>
    %29 = vector.shape_cast %28 : vector<2xf32> to vector<2x1xf32>
    %30 = tpu.concatenate %20, %23, %26, %29 in 1 : vector<2x1xf32>, vector<2x1xf32>, vector<2x1xf32>, vector<2x1xf32> -> vector<2x4xf32>
    %31 = vector.extract_strided_slice %4 {offsets = [0, 0], sizes = [2, 32], strides = [1, 1]} : vector<2x128xf32> to vector<2x32xf32>
    %cst_10 = arith.constant dense<0.000000e+00> : vector<2xf32>
    %32 = vector.multi_reduction <add>, %31, %cst_10 [1] : vector<2x32xf32> to vector<2xf32>
    %33 = vector.shape_cast %32 : vector<2xf32> to vector<2x1xf32>
    %34 = vector.extract_strided_slice %4 {offsets = [0, 32], sizes = [2, 32], strides = [1, 1]} : vector<2x128xf32> to vector<2x32xf32>
    %cst_11 = arith.constant dense<0.000000e+00> : vector<2xf32>
    %35 = vector.multi_reduction <add>, %34, %cst_11 [1] : vector<2x32xf32> to vector<2xf32>
    %36 = vector.shape_cast %35 : vector<2xf32> to vector<2x1xf32>
    %37 = vector.extract_strided_slice %4 {offsets = [0, 64], sizes = [2, 32], strides = [1, 1]} : vector<2x128xf32> to vector<2x32xf32>
    %cst_12 = arith.constant dense<0.000000e+00> : vector<2xf32>
    %38 = vector.multi_reduction <add>, %37, %cst_12 [1] : vector<2x32xf32> to vector<2xf32>
    %39 = vector.shape_cast %38 : vector<2xf32> to vector<2x1xf32>
    %40 = vector.extract_strided_slice %4 {offsets = [0, 96], sizes = [2, 32], strides = [1, 1]} : vector<2x128xf32> to vector<2x32xf32>
    %cst_13 = arith.constant dense<0.000000e+00> : vector<2xf32>
    %41 = vector.multi_reduction <add>, %40, %cst_13 [1] : vector<2x32xf32> to vector<2xf32>
    %42 = vector.shape_cast %41 : vector<2xf32> to vector<2x1xf32>
    %43 = tpu.concatenate %33, %36, %39, %42 in 1 : vector<2x1xf32>, vector<2x1xf32>, vector<2x1xf32>, vector<2x1xf32> -> vector<2x4xf32>
    %44 = math.sqrt %17 : vector<2x4xf32>
    %cst_14 = arith.constant 9.99999996E-13 : f32
    %45 = vector.broadcast %cst_14 : f32 to vector<2x4xf32>
    %46 = arith.maximumf %44, %45 : vector<2x4xf32>
    %47 = math.sqrt %30 : vector<2x4xf32>
    %cst_15 = arith.constant 9.99999996E-13 : f32
    %48 = vector.broadcast %cst_15 : f32 to vector<2x4xf32>
    %49 = arith.maximumf %47, %48 : vector<2x4xf32>
    %cst_16 = arith.constant 2.000000e+00 : f32
    %50 = vector.broadcast %cst_16 : f32 to vector<2x4xf32>
    %51 = arith.mulf %50, %43 : vector<2x4xf32>
    %52 = arith.mulf %46, %49 : vector<2x4xf32>
    %53 = arith.divf %51, %52 : vector<2x4xf32>
    %cst_17 = arith.constant 2.000000e+00 : f32
    %54 = vector.broadcast %cst_17 : f32 to vector<2x4xf32>
    %55 = arith.subf %54, %53 : vector<2x4xf32>
    %c0_18 = arith.constant 0 : index
    %c0_19 = arith.constant 0 : index
    %56 = vector.load %arg3[%c0_18, %c0_19] : memref<2x4xf32, #tpu.memory_space<vmem>>, vector<2x4xf32>
    tpu.vector_store %arg3[%c0_18, %c0_19], %55 {strides = array<i32>} : memref<2x4xf32, #tpu.memory_space<vmem>>, vector<2x4xf32>,
    return
  }
  func.func @transform_0(%arg0: i32) -> (i32, i32) {
    %c0_i32 = arith.constant 0 : i32
    %c0_i32_0 = arith.constant 0 : i32
    return %arg0, %c0_i32 : i32, i32
  }
  func.func @transform_1(%arg0: i32) -> (i32, i32) {
    %c0_i32 = arith.constant 0 : i32
    %c0_i32_0 = arith.constant 0 : i32
    return %arg0, %c0_i32 : i32, i32
  }
  func.func @transform_2(%arg0: i32) -> (i32, i32) {
    %c0_i32 = arith.constant 0 : i32
    %c0_i32_0 = arith.constant 0 : i32
    return %arg0, %c0_i32 : i32, i32
  }
}

</mosaic_0001>

<bundles_post_ra>
// kernel: tpu_custom_call.1
= control target key start
LH: loop header
LB: loop body
LE: loop exit
PB: predicated region body
PF: predicated region fallthrough
CT: control target
= control target key end

     0   :  { %7 = vsyncpa [#allocation3], 0  ;;  %s273_s0 = inlined_call_operand.hbm [shape: f32[2,128], index: 0, kind: input, shape index: {}]   ;;  %s274_s1 = inlined_call_operand.vmem [shape: f32[2,128], index: 1, kind: input, shape index: {}]   ;;  %s275_s2 = inlined_call_operand.hbm [shape: f32[2,4], index: 2, kind: output, shape index: {}]  }
   0x1   :  { %8 = vsyncpa [#allocation4], 0  ;;  %s205_s9 = smov [#allocation2]   ;;  %s157_s13 = scalar_lea.hbm %s273_s0, 32 }
   0x2   :  { %s15_s10 = sshll.u32 %s205_s9, 4  ;;  %p158_p0 = scmp.ne.s32.totalorder %s273_s0, %s157_s13  ;;  %s16_s10 = int_to_ptr.vmem [resolvable:$true] %s15_s10 }
   0x3   :  { %p161_p1 = scmp.lt.u32.totalorder %s157_s13, %s273_s0 }
   0x5   :  { %p163_p2 = pnand %p161_p1, %p158_p0 }
   0x7   :  { %166 = shalt.err (!%p163_p2)
}
   0x8   :  { %s167_s18 = scalar_lea.vmem %s16_s10, 32  ;;  %p172_p4 = scmp.lt.s32.totalorder %s16_s10, %s16_s10 }
   0x9   :  { %p168_p3 = scmp.ne.s32.totalorder %s16_s10, %s167_s18  ;;  %p173_p5 = scmp.lt.s32.totalorder %s167_s18, %s167_s18 }
   0xb   :  { %p174_p6 = por %p173_p5, %p172_p4 }
   0xd   :  { %p175_p7 = pnand %p174_p6, %p168_p3 }
   0xf   :  { %178 = shalt.err (!%p175_p7)
}
  0x10   :  { %18 = dma.hbm_to_vmem [thread:$0]  %s273_s0, 32, %s16_s10, [#allocation3]  }
  0x11   :  { %201 = dma.done.wait [#allocation3], 32  }
  0x12   :  { %202 = vsyncadd [#allocation3], 4294967264  ;;  %v24_v0 = vld [vmem:[#allocation2] sm:$0x3]  ;;  %vm29_vm0 = vcmask 254976   ;;  %s206_s23 = smov 64  }
  0x13   :  { %v25_v1 = vld [vmem:[%s274_s1] sm:$0x3]  ;;  %v26_v2 = vmul.f32 %v24_v0, %v24_v0  ;;  %s207_s24 = smov 96   ;;  %s208_s25 = smov 32   ;;  %vm52_vm1 = vcmask 7168   ;;  %vm54_vm2 = vcmask 15360  }
  0x14   :  { %v27_v4 = vmul.f32 %v25_v1, %v25_v1  ;;  %v28_v5 = vmul.f32 %v25_v1, %v24_v0  ;;  %vm56_vm3 = vcmask 23552   ;;  %s209_s0 = smov [#allocation5]   ;;  %vm129_vm8 = vcmask 25600  }
  0x15   :  { %v30_v3 = vsel %vm29_vm0, %v26_v2, 0.0  ;;  %40 = vrot.lane.b32.xlu1 %v26_v2, %s206_s23  ;;  %s137_s1 = sshll.u32 %s209_s0, 4  ;;  %s138_s1 = int_to_ptr.vmem [resolvable:$true] %s137_s1 }
  0x16   :  { %31 = vadd.xlane.f32.xlu0 %v30_v3  ;;  %v58_v6 = vsel %vm29_vm0, %v27_v4, 0.0  ;;  %v83_v22 = vsel %vm29_vm0, %v28_v5, 0.0  ;;  %s179_s26 = scalar_lea.vmem %s138_s1, 32  ;;  %p184_p9 = scmp.lt.s32.totalorder %s138_s1, %s138_s1 }
  0x17   :  { %p180_p8 = scmp.ne.s32.totalorder %s138_s1, %s179_s26  ;;  %p185_p10 = scmp.lt.s32.totalorder %s179_s26, %s179_s26 }
  0x19   :  { %62 = vrot.lane.b32.xlu1 %v27_v4, %s207_s24  ;;  %p186_p11 = por %p185_p10, %p184_p9 }
  0x1b   :  { %p187_p12 = pnand %p186_p11, %p180_p8 }
  0x1d   :  { %74 = vrot.lane.b32.xlu1 %v27_v4, %s208_s25 }
  0x2c   :  { %34 = vrot.lane.b32.xlu0 %v26_v2, %s207_s24 }
  0x30   :  { %46 = vrot.lane.b32.xlu0 %v26_v2, %s208_s25 }
  0x34   :  { %68 = vrot.lane.b32.xlu0 %v27_v4, %s206_s23 }
  0x38   :  { %87 = vrot.lane.b32.xlu0 %v28_v5, %s207_s24 }
  0x3c   :  { %93 = vrot.lane.b32.xlu0 %v28_v5, %s206_s23 }
  0x40   :  { %99 = vrot.lane.b32.xlu0 %v28_v5, %s208_s25 }
  0x41   :  { %59 = vadd.xlane.f32.xlu1 %v58_v6 }
  0x87   :  { %v41_v8 = vpop.permute.xlu1 %40 }
  0x88   :  { %v43_v12 = vsel %vm29_vm0, %v41_v8, 0.0 }
  0x8b   :  { %v63_v11 = vpop.permute.xlu1 %62 }
  0x8c   :  { %v65_v15 = vsel %vm29_vm0, %v63_v11, 0.0 }
  0x8f   :  { %v75_v17 = vpop.permute.xlu1 %74 }
  0x90   :  { %v77_v19 = vsel %vm29_vm0, %v75_v17, 0.0 }
  0xa3   :  { %v32_v7 = vpop.xlane.xlu0 %31 }
  0xa7   :  { %v35_v9 = vpop.permute.xlu0 %34 }
  0xa8   :  { %v37_v10 = vsel %vm29_vm0, %v35_v9, 0.0 }
  0xa9   :  { %38 = vadd.xlane.f32.xlu1 %v37_v10 }
  0xab   :  { %v47_v13 = vpop.permute.xlu0 %46 }
  0xac   :  { %v49_v14 = vsel %vm29_vm0, %v47_v13, 0.0 }
  0xad   :  { %44 = vadd.xlane.f32.xlu1 %v43_v12  ;;  %50 = vadd.xlane.f32.xlu0 %v49_v14 }
  0xaf   :  { %v69_v16 = vpop.permute.xlu0 %68 }
  0xb0   :  { %v71_v18 = vsel %vm29_vm0, %v69_v16, 0.0 }
  0xb1   :  { %66 = vadd.xlane.f32.xlu0 %v65_v15  ;;  %72 = vadd.xlane.f32.xlu1 %v71_v18 }
  0xb3   :  { %v88_v20 = vpop.permute.xlu0 %87 }
  0xb4   :  { %v90_v21 = vsel %vm29_vm0, %v88_v20, 0.0 }
  0xb5   :  { %78 = vadd.xlane.f32.xlu1 %v77_v19  ;;  %91 = vadd.xlane.f32.xlu0 %v90_v21 }
  0xb7   :  { %v94_v23 = vpop.permute.xlu0 %93 }
  0xb8   :  { %v96_v24 = vsel %vm29_vm0, %v94_v23, 0.0 }
  0xb9   :  { %84 = vadd.xlane.f32.xlu1 %v83_v22 }
  0xbb   :  { %v100_v25 = vpop.permute.xlu0 %99 }
  0xbc   :  { %v102_v26 = vsel %vm29_vm0, %v100_v25, 0.0 }
  0xbd   :  { %97 = vadd.xlane.f32.xlu1 %v96_v24  ;;  %103 = vadd.xlane.f32.xlu0 %v102_v26 }
  0xce   :  { %v60_v27 = vpop.xlane.xlu1 %59 }
 0x136   :  { %v39_v28 = vpop.xlane.xlu1 %38 }
 0x137   :  { %v53_v29 = vsel %vm52_vm1, %v32_v7, %v39_v28 }
 0x13a   :  { %v45_v30 = vpop.xlane.xlu1 %44  ;;  %v51_v31 = vpop.xlane.xlu0 %50 }
 0x13b   :  { %v55_v32 = vsel %vm54_vm2, %v53_v29, %v45_v30 }
 0x13c   :  { %v57_v33 = vsel %vm56_vm3, %v55_v32, %v51_v31 }
 0x13d   :  { %151 = vrsqrt.f32 %v57_v33  ;;  %vm110_vm4 = vcmp.eq.f32.partialorder %v57_v33, inf  ;;  %v113_v44 = vand.u32 2147483648, %v57_v33  ;;  %vm112_vm5 = vcmp.eq.f32.partialorder %v57_v33, 0.0 }
 0x13e   :  { %v73_v34 = vpop.xlane.xlu1 %72  ;;  %v67_v35 = vpop.xlane.xlu0 %66 }
 0x13f   :  { %v80_v36 = vsel %vm52_vm1, %v60_v27, %v67_v35 }
 0x140   :  { %v81_v38 = vsel %vm54_vm2, %v80_v36, %v73_v34 }
 0x142   :  { %v79_v37 = vpop.xlane.xlu1 %78  ;;  %v92_v53 = vpop.xlane.xlu0 %91 }
 0x143   :  { %v82_v39 = vsel %vm56_vm3, %v81_v38, %v79_v37 }
 0x144   :  { %153 = vrsqrt.f32 %v82_v39  ;;  %vm118_vm6 = vcmp.eq.f32.partialorder %v82_v39, inf  ;;  %v121_v47 = vand.u32 2147483648, %v82_v39  ;;  %vm120_vm7 = vcmp.eq.f32.partialorder %v82_v39, 0.0 }
 0x146   :  { %v85_v49 = vpop.xlane.xlu1 %84 }
 0x147   :  { %v152_v40 = vpop.eup %151  ;;  %v105_v55 = vsel %vm52_vm1, %v85_v49, %v92_v53 }
 0x148   :  { %v109_v41 = vmul.f32 %v152_v40, %v57_v33 }
 0x14a   :  { %v111_v42 = vsel %vm110_vm4, %v57_v33, %v109_v41  ;;  %v98_v56 = vpop.xlane.xlu1 %97  ;;  %v104_v58 = vpop.xlane.xlu0 %103 }
 0x14b   :  { %v114_v46 = vsel %vm112_vm5, %v113_v44, %v111_v42  ;;  %v106_v57 = vsel %vm54_vm2, %v105_v55, %v98_v56 }
 0x14c   :  { %v115_v51 = vmax.f32 %v114_v46, 1e-12  ;;  %v107_v59 = vsel %vm56_vm3, %v106_v57, %v104_v58 }
 0x14d   :  { %v124_v60 = vmul.f32 2.0, %v107_v59 }
 0x14e   :  { %v154_v43 = vpop.eup %153 }
 0x14f   :  { %v117_v45 = vmul.f32 %v154_v43, %v82_v39 }
 0x151   :  { %v119_v48 = vsel %vm118_vm6, %v82_v39, %v117_v45 }
 0x152   :  { %v122_v50 = vsel %vm120_vm7, %v121_v47, %v119_v48 }
 0x153   :  { %v123_v52 = vmax.f32 %v122_v50, 1e-12 }
 0x155   :  { %v125_v54 = vmul.f32 %v123_v52, %v115_v51 }
 0x157   :  { %155 = vrcp.f32 %v125_v54 }
 0x161   :  { %v156_v61 = vpop.eup %155 }
 0x162   :  { %v127_v62 = vmul.f32 %v156_v61, %v124_v60 }
 0x164   :  { %v128_v63 = vsub.f32 2.0, %v127_v62 }
 0x166   :  { %130 = vst.msk [vmem:[#allocation5] sm:$0x3] %vm129_vm8, %v128_v63 }
 0x167   :  { %190 = shalt.err (!%p187_p12)
}
 0x168   :  { %s191_s29 = scalar_lea.hbm %s275_s2, 32 }
 0x169   :  { %p192_p13 = scmp.ne.s32.totalorder %s275_s2, %s191_s29  ;;  %p195_p0 = scmp.lt.u32.totalorder %s191_s29, %s275_s2 }
 0x16b   :  { %p197_p1 = pnand %p195_p0, %p192_p13 }
 0x16d   :  { %200 = shalt.err (!%p197_p1)
}
 0x16e   :  { %140 = dma.vmem_to_hbm [thread:$0]  %s138_s1, 32, %s275_s2, [#allocation4]  }
 0x16f   :  { %203 = dma.done.wait [#allocation4], 32  }
 0x170   :  { %204 = vsyncadd [#allocation4], 4294967264 }
 0x171   :  { %144 = vsyncpa [#allocation3], 1 }
 0x172   :  { %145 = vsyncpa [#allocation4], 1 }

</bundles_post_ra>
